<compile_context>
chip_gen: v7x
topology: tpu7x:2x2x1
jax: 0.10.0
libtpu: 0.0.40
codegen_flags: <defaults>
</compile_context>

<pallas_src>
import jax
import jax.numpy as jnp
from jax.experimental import pallas as pl
from jax.experimental.pallas import tpu as pltpu


def _round_up(v, m):
    return (v + m - 1) // m * m


def _pad2d(a, shape):
    """Zero-pad a 2-D array up to `shape` (no-op if already that shape)."""
    pr = shape[0] - a.shape[0]
    pc = shape[1] - a.shape[1]
    if pr == 0 and pc == 0:
        return a
    return jnp.pad(a, ((0, pr), (0, pc)))


# ---------------------------------------------------------------------------
# Pass 1: LoRA down-projection  h = x @ A^T   (rank padded to 128 lanes, f32)
# ---------------------------------------------------------------------------
def _lora_down_kernel(x_ref, at_ref, h_ref):
    # grid = (M//tm, K//tk); K innermost reduction.
    # Output block index is (i, 0) -> resident across k, accumulate in place.
    @pl.when(pl.program_id(1) == 0)
    def _init():
        h_ref[...] = jnp.zeros_like(h_ref)

    h_ref[...] += jnp.dot(x_ref[...], at_ref[...],
                          preferred_element_type=jnp.float32)


# ---------------------------------------------------------------------------
# Pass 2: y = x @ W^T + b + h @ (B^T * alpha/rank)
# ---------------------------------------------------------------------------
def _lora_main_kernel(x_ref, wt_ref, b_ref, h_ref, bt_ref, o_ref, acc_ref):
    # grid = (M//tm, N//tn, K//tk); K innermost reduction.
    # x_ref:  (tm, tk)   input row tile
    # wt_ref: (tk, tn)   base weight, transposed
    # b_ref:  (1,  tn)   base bias
    # h_ref:  (tm, Rp)   LoRA down-projection (f32, precomputed in pass 1)
    # bt_ref: (Rp, tn)   lora_B^T, pre-scaled by alpha/rank
    # acc_ref:(tm, tn)   f32 accumulator
    k = pl.program_id(2)
    nk = pl.num_programs(2)

    @pl.when(k == 0)
    def _init():
        # Fold the bias into the accumulator init (saves an epilogue VPU add).
        acc_ref[...] = jnp.broadcast_to(b_ref[...].astype(jnp.float32),
                                        acc_ref.shape)

    acc_ref[...] += jnp.dot(x_ref[...], wt_ref[...],
                            preferred_element_type=jnp.float32)

    @pl.when(k == nk - 1)
    def _finalize():
        # LoRA up-projection; alpha/rank scaling is already folded into B^T.
        lora = jnp.dot(h_ref[...], bt_ref[...],
                       preferred_element_type=jnp.float32)
        o_ref[...] = (acc_ref[...] + lora).astype(o_ref.dtype)


# ---------------------------------------------------------------------------
# One-time parameter preparation (do this at load time, NOT per forward call).
# ---------------------------------------------------------------------------
def prepare_lora_params(w, b, lora_a, lora_b, alpha, rank, *, tn=512, tk=512):
    """w: (out, in). b: (out,). lora_a: (rank, in). lora_b: (out, rank)."""
    N, K = w.shape
    assert lora_a.shape == (rank, K)
    assert lora_b.shape == (N, rank)
    scaling = float(alpha) / float(rank)

    tn_e = min(tn, _round_up(N, 128))
    tk_e = min(tk, _round_up(K, 128))
    Np = _round_up(N, tn_e)
    Kp = _round_up(K, tk_e)
    Rp = _round_up(rank, 128)       # pad LoRA rank to a full lane width

    return dict(
        wt_p=_pad2d(w.T, (Kp, Np)),                   # W^T, padded
        b_p=_pad2d(b.reshape(1, N), (1, Np)),         # bias, padded
        at_p=_pad2d(lora_a.T, (Kp, Rp)),              # A^T, padded
        bt_p=_pad2d(lora_b.T * scaling, (Rp, Np)),    # B^T * (alpha/rank)
        N=N, K=K, Np=Np, Kp=Kp, Rp=Rp, tn_e=tn_e, tk_e=tk_e,
    )


def lora_forward(x, params, *, tm=512):
    """x: (..., in_features). params: output of prepare_lora_params."""
    K, N = params["K"], params["N"]
    Kp, Np, Rp = params["Kp"], params["Np"], params["Rp"]
    tk_e, tn_e = params["tk_e"], params["tn_e"]

    lead_shape = x.shape[:-1]
    x2d = x.reshape(-1, K)
    M = x2d.shape[0]

    # Sublane multiple: 16-row packing for 2-byte dtypes, 8 rows for 4-byte.
    sub = 16 if jnp.dtype(x.dtype).itemsize == 2 else 8
    tm_e = min(tm, _round_up(M, sub))
    Mp = _round_up(M, tm_e)

    x_p = _pad2d(x2d, (Mp, Kp))

    # ---- Pass 1: h = x @ A^T (f32), A^T streamed exactly once. -------------
    h_p = pl.pallas_call(
        _lora_down_kernel,
        out_shape=jax.ShapeDtypeStruct((Mp, Rp), jnp.float32),
        grid_spec=pltpu.PrefetchScalarGridSpec(
            num_scalar_prefetch=0,
            grid=(Mp // tm_e, Kp // tk_e),
            in_specs=[
                pl.BlockSpec((tm_e, tk_e), lambda i, k: (i, k)),   # x tile
                pl.BlockSpec((tk_e, Rp), lambda i, k: (k, 0)),     # A^T tile
            ],
            out_specs=pl.BlockSpec((tm_e, Rp), lambda i, k: (i, 0)),
        ),
        compiler_params=pltpu.CompilerParams(
            dimension_semantics=("parallel", "arbitrary")),
    )(x_p, params["at_p"])

    # ---- Pass 2: y = x @ W^T + b + h @ (scaled B^T). -----------------------
    out_p = pl.pallas_call(
        _lora_main_kernel,
        out_shape=jax.ShapeDtypeStruct((Mp, Np), x.dtype),
        grid_spec=pltpu.PrefetchScalarGridSpec(
            num_scalar_prefetch=0,
            grid=(Mp // tm_e, Np // tn_e, Kp // tk_e),
            in_specs=[
                pl.BlockSpec((tm_e, tk_e), lambda i, j, k: (i, k)),  # x
                pl.BlockSpec((tk_e, tn_e), lambda i, j, k: (k, j)),  # W^T
                pl.BlockSpec((1, tn_e), lambda i, j, k: (0, j)),     # bias
                pl.BlockSpec((tm_e, Rp), lambda i, j, k: (i, 0)),    # h
                pl.BlockSpec((Rp, tn_e), lambda i, j, k: (0, j)),    # B^T*s
            ],
            out_specs=pl.BlockSpec((tm_e, tn_e), lambda i, j, k: (i, j)),
            scratch_shapes=[
                pltpu.VMEM((tm_e, tn_e), jnp.float32),   # base accumulator
            ],
        ),
        compiler_params=pltpu.CompilerParams(
            dimension_semantics=("parallel", "parallel", "arbitrary")),
    )(x_p, params["wt_p"], params["b_p"], h_p, params["bt_p"])

    return out_p[:M, :N].reshape(*lead_shape, N)


def lora_reference(x, w, b, lora_a, lora_b, alpha, rank):
    scaling = float(alpha) / float(rank)
    base = jnp.einsum("...k,nk->...n", x, w) + b
    lora = jnp.einsum("...r,nr->...n",
                      jnp.einsum("...k,rk->...r", x, lora_a), lora_b)
    return base + lora * scaling


if __name__ == "__main__":
    key = jax.random.PRNGKey(0)
    k_x, k_w, k_b, k_a, k_lb = jax.random.split(key, 5)

    batch, seq, in_features, out_features = 2, 8, 32, 32
    rank, alpha = 4, 8.0

    x = jax.random.normal(k_x, (batch, seq, in_features), dtype=jnp.float32)
    w = jax.random.normal(k_w, (out_features, in_features), dtype=jnp.float32) * 0.1
    b = jax.random.normal(k_b, (out_features,), dtype=jnp.float32) * 0.1
    lora_a = jax.random.normal(k_a, (rank, in_features), dtype=jnp.float32) * 0.1
    # NOTE: the module inits lora_B to zeros; we use small nonzero values so
    # the LoRA matmul path is actually exercised/verified.
    lora_b = jax.random.normal(k_lb, (out_features, rank), dtype=jnp.float32) * 0.1

    # One-time parameter prep (transpose / pad / fold alpha-rank scaling).
    params = prepare_lora_params(w, b, lora_a, lora_b, alpha, rank)

    out = lora_forward(x, params)
    out = jax.block_until_ready(out)

    ref = lora_reference(x, w, b, lora_a, lora_b, alpha, rank)
    assert out.shape == (batch, seq, out_features)
    assert jnp.allclose(out, ref, atol=1e-4, rtol=1e-4), "mismatch vs reference"

    print("KERNEL_OK")
</pallas_src>

<mosaic_0001>
module attributes {stable_mosaic.version = 11 : i64} {
  func.func @_lora_down_kernel(%arg0: i32, %arg1: i32, %arg2: memref<16x128xf32, #tpu.memory_space<vmem>>, %arg3: memref<128x128xf32, #tpu.memory_space<vmem>>, %arg4: memref<16x128xf32, #tpu.memory_space<vmem>>) attributes {dimension_semantics = [#tpu.dimension_semantics<parallel>, #tpu.dimension_semantics<arbitrary>], iteration_bounds = array<i64: 1, 1>, scalar_prefetch = 0 : i64, scratch_operands = 0 : i64, tpu.core_type = #tpu.core_type<tc>, window_params = [{transform_indices = @transform_0, window_bounds = array<i64: 16, 128>}, {transform_indices = @transform_1, window_bounds = array<i64: 128, 128>}, {transform_indices = @transform_2, window_bounds = array<i64: 16, 128>}]} {
    %c0_i32 = arith.constant 0 : i32
    %0 = arith.cmpi eq, %arg1, %c0_i32 : i32
    %1 = arith.extui %0 : i1 to i32
    %c0_i32_0 = arith.constant 0 : i32
    %2 = arith.cmpi ne, %1, %c0_i32_0 : i32
    scf.if %2 {
      %cst_8 = arith.constant 0.000000e+00 : f32
      %9 = vector.broadcast %cst_8 : f32 to vector<16x128xf32>
      %c0_9 = arith.constant 0 : index
      %c0_10 = arith.constant 0 : index
      %10 = vector.load %arg4[%c0_9, %c0_10] : memref<16x128xf32, #tpu.memory_space<vmem>>, vector<16x128xf32>
      tpu.vector_store %arg4[%c0_9, %c0_10], %9 {strides = array<i32>} : memref<16x128xf32, #tpu.memory_space<vmem>>, vector<16x128xf32>,
    } else {
    }
    %c0 = arith.constant 0 : index
    %c0_1 = arith.constant 0 : index
    %3 = vector.load %arg4[%c0, %c0_1] : memref<16x128xf32, #tpu.memory_space<vmem>>, vector<16x128xf32>
    %c0_2 = arith.constant 0 : index
    %c0_3 = arith.constant 0 : index
    %4 = vector.load %arg2[%c0_2, %c0_3] : memref<16x128xf32, #tpu.memory_space<vmem>>, vector<16x128xf32>
    %c0_4 = arith.constant 0 : index
    %c0_5 = arith.constant 0 : index
    %5 = vector.load %arg3[%c0_4, %c0_5] : memref<128x128xf32, #tpu.memory_space<vmem>>, vector<128x128xf32>
    %cst = arith.constant dense<0.000000e+00> : vector<16x128xf32>
    %6 = tpu.matmul %4, %5, %cst {dimension_numbers = #tpu.dot_dimension_numbers<[1], [0], [0], [1], [0, 0, 1, 1], [], []>} : vector<16x128xf32>, vector<128x128xf32>, vector<16x128xf32> -> vector<16x128xf32>
    %7 = arith.addf %3, %6 : vector<16x128xf32>
    %c0_6 = arith.constant 0 : index
    %c0_7 = arith.constant 0 : index
    %8 = vector.load %arg4[%c0_6, %c0_7] : memref<16x128xf32, #tpu.memory_space<vmem>>, vector<16x128xf32>
    tpu.vector_store %arg4[%c0_6, %c0_7], %7 {strides = array<i32>} : memref<16x128xf32, #tpu.memory_space<vmem>>, vector<16x128xf32>,
    return
  }
  func.func @transform_0(%arg0: i32, %arg1: i32) -> (i32, i32) {
    %c0_i32 = arith.constant 0 : i32
    return %arg0, %arg1 : i32, i32
  }
  func.func @transform_1(%arg0: i32, %arg1: i32) -> (i32, i32) {
    %c0_i32 = arith.constant 0 : i32
    %c0_i32_0 = arith.constant 0 : i32
    return %arg1, %c0_i32 : i32, i32
  }
  func.func @transform_2(%arg0: i32, %arg1: i32) -> (i32, i32) {
    %c0_i32 = arith.constant 0 : i32
    %c0_i32_0 = arith.constant 0 : i32
    return %arg0, %c0_i32 : i32, i32
  }
}

</mosaic_0001>

<bundles_post_ra>
// kernel: tpu_custom_call.1
= control target key start
LH: loop header
LB: loop body
LE: loop exit
PB: predicated region body
PF: predicated region fallthrough
CT: control target
= control target key end

     0   :  { %7 = vsyncpa [#allocation3], 0  ;;  %s391_s0 = inlined_call_operand.hbm [shape: f32[16,128], index: 0, kind: input, shape index: {}]   ;;  %s392_s1 = inlined_call_operand.hbm [shape: f32[128,128], index: 1, kind: input, shape index: {}]   ;;  %s393_s2 = inlined_call_operand.hbm [shape: f32[16,128], index: 2, kind: output, shape index: {}]  }
   0x1   :  { %8 = vsyncpa [#allocation6], 0 }
   0x2   :  { %9 = vsyncpa [#allocation4], 0  ;;  %s326_s9 = smov [#allocation2]   ;;  %s254_s13 = scalar_lea.hbm %s391_s0, 256 }
   0x3   :  { %s15_s10 = sshll.u32 %s326_s9, 4  ;;  %p255_p0 = scmp.ne.s32.totalorder %s391_s0, %s254_s13  ;;  %s16_s10 = int_to_ptr.vmem [resolvable:$true] %s15_s10 }
   0x4   :  { %p258_p1 = scmp.lt.u32.totalorder %s254_s13, %s391_s0 }
   0x6   :  { %p260_p2 = pnand %p258_p1, %p255_p0 }
   0x8   :  { %263 = shalt.err (!%p260_p2)
}
   0x9   :  { %s264_s18 = scalar_lea.vmem %s16_s10, 256  ;;  %p269_p4 = scmp.lt.s32.totalorder %s16_s10, %s16_s10 }
   0xa   :  { %p265_p3 = scmp.ne.s32.totalorder %s16_s10, %s264_s18  ;;  %p270_p5 = scmp.lt.s32.totalorder %s264_s18, %s264_s18 }
   0xc   :  { %p271_p6 = por %p270_p5, %p269_p4 }
   0xe   :  { %p272_p7 = pnand %p271_p6, %p265_p3 }
  0x10   :  { %275 = shalt.err (!%p272_p7)
}
  0x11   :  { %s327_s19 = smov 128   ;;  %s328_s20 = smov 8  }
  0x12   :  { %21 = dma.hbm_to_vmem [thread:$0]  %s391_s0, 256, %s16_s10, [#allocation3], %s327_s19, %s327_s19, %s328_s20  }
  0x13   :  { %s329_s23 = smov [#allocation5]   ;;  %s276_s27 = scalar_lea.hbm %s392_s1, 2048 }
  0x14   :  { %s27_s24 = sshll.u32 %s329_s23, 4  ;;  %p277_p8 = scmp.ne.s32.totalorder %s392_s1, %s276_s27  ;;  %s28_s24 = int_to_ptr.vmem [resolvable:$true] %s27_s24 }
  0x15   :  { %p280_p9 = scmp.lt.u32.totalorder %s276_s27, %s392_s1 }
  0x17   :  { %p282_p10 = pnand %p280_p9, %p277_p8 }
  0x19   :  { %285 = shalt.err (!%p282_p10)
}
  0x1a   :  { %s286_s4 = scalar_lea.vmem %s28_s24, 2048  ;;  %p291_p12 = scmp.lt.s32.totalorder %s28_s24, %s28_s24 }
  0x1b   :  { %p287_p11 = scmp.ne.s32.totalorder %s28_s24, %s286_s4  ;;  %p292_p13 = scmp.lt.s32.totalorder %s286_s4, %s286_s4 }
  0x1d   :  { %p293_p0 = por %p292_p13, %p291_p12 }
  0x1f   :  { %p294_p1 = pnand %p293_p0, %p287_p11 }
  0x21   :  { %297 = shalt.err (!%p294_p1)
}
  0x22   :  { %33 = dma.hbm_to_vmem [thread:$0]  %s392_s1, 2048, %s28_s24, [#allocation6], %s327_s19, %s327_s19, %s328_s20  }
  0x23   :  { %320 = dma.done.wait [#allocation3], 256  }
  0x24   :  { %321 = vsyncadd [#allocation3], 4294967040 }
  0x25   :  { %322 = dma.done.wait [#allocation6], 2048  }
  0x26   :  { %323 = vsyncadd [#allocation6], 4294965248  ;;  %v50_v0 = vld [vmem:[#allocation5] sm:$0xff]  ;;  %v51_v1 = vld [vmem:[#allocation5 + $0x8] sm:$0xff]  ;;  %s330_s1 = smov [#allocation7]  }
  0x27   :  { %v52_v2 = vld [vmem:[#allocation5 + $0x10] sm:$0xff]  ;;  %v216_v3 = vpack.c.bf16 %v51_v1, %v50_v0  ;;  %v53_v4 = vld [vmem:[#allocation5 + $0x18] sm:$0xff]  ;;  %v54_v6 = vld [vmem:[#allocation5 + $0x20] sm:$0xff]  ;;  %s150_s6 = sshll.u32 %s330_s1, 4  ;;  %s151_s6 = int_to_ptr.vmem [resolvable:$true] %s150_s6 }
  0x28   :  { %v220_v5 = vpack.c.bf16 %v53_v4, %v52_v2  ;;  %v55_v7 = vld [vmem:[#allocation5 + $0x28] sm:$0xff]  ;;  %v48_v9 = vld [vmem:[#allocation2] sm:$0xff]  ;;  %v57_v11 = vld [vmem:[#allocation5 + $0x38] sm:$0xff]  ;;  %s298_s7 = scalar_lea.vmem %s151_s6, 256  ;;  %p303_p3 = scmp.lt.s32.totalorder %s151_s6, %s151_s6 }
  0x29   :  { %217 = vmatprep.subr.bf16.mxu0 %v216_v3  ;;  %v224_v8 = vpack.c.bf16 %v55_v7, %v54_v6  ;;  %v56_v10 = vld [vmem:[#allocation5 + $0x30] sm:$0xff]  ;;  %213 = vmatprep.mubr.f32.mxu0 %v48_v9  ;;  %v58_v13 = vld [vmem:[#allocation5 + $0x40] sm:$0xff]  ;;  %v59_v14 = vld [vmem:[#allocation5 + $0x48] sm:$0xff]  ;;  %p299_p2 = scmp.ne.s32.totalorder %s151_s6, %s298_s7  ;;  %p304_p4 = scmp.lt.s32.totalorder %s298_s7, %s298_s7 }
  0x2a   :  { %219 = vmatpush3.bf16.msra.mxu0 %v216_v3  ;;  %v228_v12 = vpack.c.bf16 %v57_v11, %v56_v10  ;;  %v232_v15 = vpack.c.bf16 %v59_v14, %v58_v13  ;;  %v60_v16 = vld [vmem:[#allocation5 + $0x50] sm:$0xff]  ;;  %v61_v17 = vld [vmem:[#allocation5 + $0x58] sm:$0xff]  ;;  %v62_v19 = vld [vmem:[#allocation5 + $0x60] sm:$0xff] }
  0x2b   :  { %221 = vmatprep.subr.bf16.mxu0 %v220_v5  ;;  %v236_v18 = vpack.c.bf16 %v61_v17, %v60_v16  ;;  %v63_v20 = vld [vmem:[#allocation5 + $0x68] sm:$0xff]  ;;  %v64_v22 = vld [vmem:[#allocation5 + $0x70] sm:$0xff]  ;;  %v65_v23 = vld [vmem:[#allocation5 + $0x78] sm:$0xff]  ;;  %p305_p5 = por %p304_p4, %p303_p3 }
  0x2c   :  { %v240_v21 = vpack.c.bf16 %v63_v20, %v62_v19  ;;  %v244_v24 = vpack.c.bf16 %v65_v23, %v64_v22  ;;  %v49_v25 = vld [vmem:[#allocation2 + $0x8] sm:$0xff] }
  0x2d   :  { %p306_p6 = pnand %p305_p5, %p299_p2 }
  0x2e   :  { %223 = vmatpush3.bf16.msra.mxu0 %v220_v5 }
  0x2f   :  { %225 = vmatprep.subr.bf16.mxu0 %v224_v8 }
  0x32   :  { %227 = vmatpush3.bf16.msra.mxu0 %v224_v8 }
  0x33   :  { %229 = vmatprep.subr.bf16.mxu0 %v228_v12 }
  0x36   :  { %231 = vmatpush3.bf16.msra.mxu0 %v228_v12 }
  0x37   :  { %233 = vmatprep.subr.bf16.mxu0 %v232_v15 }
  0x3a   :  { %235 = vmatpush3.bf16.msra.mxu0 %v232_v15 }
  0x3b   :  { %237 = vmatprep.subr.bf16.mxu0 %v236_v18 }
  0x3e   :  { %239 = vmatpush3.bf16.msra.mxu0 %v236_v18 }
  0x3f   :  { %241 = vmatprep.subr.bf16.mxu0 %v240_v21 }
  0x42   :  { %243 = vmatpush3.bf16.msra.mxu0 %v240_v21 }
  0x43   :  { %245 = vmatprep.subr.bf16.mxu0 %v244_v24 }
  0x46   :  { %247 = vmatpush3.bf16.msra.mxu0 %v244_v24 }
  0x49   :  { %214 = vmatmul.mubr.f32.vlgmr.msra.gmra.mrb[0].mxu0 %v49_v25 }
 0x11c   :  { %v215_v26 = vpop.f32.mrb[0].mxu0 }
 0x11d   :  { %v132_v27 = vpop.f32.mrb[1].mxu0  ;;  %144 = vst [vmem:[#allocation7 + $0x8] sm:$0xff] %v215_v26 }
 0x11e   :  { %143 = vst [vmem:[#allocation7] sm:$0xff] %v132_v27 }
 0x11f   :  { %309 = shalt.err (!%p306_p6)
}
 0x120   :  { %s310_s10 = scalar_lea.hbm %s393_s2, 256 }
 0x121   :  { %p311_p7 = scmp.ne.s32.totalorder %s393_s2, %s310_s10  ;;  %p314_p8 = scmp.lt.u32.totalorder %s310_s10, %s393_s2 }
 0x123   :  { %p316_p9 = pnand %p314_p8, %p311_p7 }
 0x125   :  { %319 = shalt.err (!%p316_p9)
}
 0x126   :  { %156 = dma.vmem_to_hbm [thread:$0]  %s151_s6, 256, %s393_s2, [#allocation4], %s327_s19, %s327_s19, %s328_s20  }
 0x127   :  { %324 = dma.done.wait [#allocation4], 256  }
 0x128   :  { %325 = vsyncadd [#allocation4], 4294967040 }
 0x129   :  { %160 = vsyncpa [#allocation3], 1 }
 0x12a   :  { %161 = vsyncpa [#allocation6], 1 }
 0x12b   :  { %162 = vsyncpa [#allocation4], 1 }

</bundles_post_ra>
